<compile_context>
chip_gen: v5e
topology: v5e:2x2
jax: 0.10.0
libtpu: 0.0.40
codegen_flags: <defaults>
</compile_context>

<pallas_src>
import functools

import jax
import jax.numpy as jnp
from jax.experimental import pallas as pl
from jax.experimental.pallas import tpu as pltpu


def _round_up(x, m):
    return -(-x // m) * m


def _make_mlp_kernel(num_layers, lin_dims, col_offsets, slab_width,
                     store_dtype):
    """Kernel for an MLP with `num_layers` bias-free Linear layers.

    ReLU follows every Linear except the last (matching the PyTorch module)
    and is applied in-register; only the Linear outputs are written to HBM,
    packed side-by-side into one lane-dense slab of width `slab_width`
    (a multiple of 128).  Weights arrive pre-transposed as [in, out].
    """
    pad_cols = slab_width - (col_offsets[-1] + lin_dims[-1])

    def kernel(x_ref, *refs):
        w_refs = refs[:num_layers]
        out_ref = refs[num_layers]

        act = x_ref[...].astype(jnp.float32)
        for layer in range(num_layers):
            # Linear (bias=False): act @ W  (W already [in, out]) on the MXU.
            act = jnp.dot(act, w_refs[layer][...],
                          preferred_element_type=jnp.float32)
            off = col_offsets[layer]
            d = lin_dims[layer]
            out_ref[:, off:off + d] = act.astype(store_dtype)
            if layer < num_layers - 1:
                act = jnp.maximum(act, 0.0)       # ReLU on the VPU (no store)
        if pad_cols:
            # Keep the lane-padding columns deterministic (sliced off later).
            out_ref[:, slab_width - pad_cols:] = jnp.zeros(
                (out_ref.shape[0], pad_cols), store_dtype)

    return kernel


def init_deep_occ_params(topology, key):
    """Deterministic bias-free Linear weights, PyTorch [out, in] convention."""
    pairs = list(zip(topology[:-1], topology[1:]))
    weights = []
    for (fan_in, fan_out) in pairs:
        key, sub = jax.random.split(key)
        bound = 1.0 / jnp.sqrt(jnp.float32(fan_in))  # kaiming-uniform-ish
        w = jax.random.uniform(sub, (fan_out, fan_in), jnp.float32,
                               minval=-bound, maxval=bound)
        weights.append(w)
    return weights


def _vmem_budget():
    """Generation-aware VMEM limit + activation-tile budget.

    v5e/v6e report 128 MiB -> ~96 MiB limit; v7x reports 64 MiB per TC ->
    48 MiB limit.  Falls back to the conservative (v7x) figure."""
    try:
        cap = int(pltpu.get_tpu_info().vmem_capacity_bytes)
    except Exception:
        cap = 64 << 20
    vmem_limit = min((cap * 3) // 4, 100 << 20)
    act_budget = vmem_limit // 2    # double-buffered input + output tiles
    return int(vmem_limit), int(act_budget)


def _choose_batch_tile(B, d_in, slab_width, store_bytes, act_budget,
                       row_align=8, max_rows=16384):
    """Largest batch tile (multiple of row_align) whose double-buffered
    input + output-slab tiles fit the activation budget, capped so the
    grid keeps >=2 blocks whenever the batch allows (v7x megacore)."""
    bytes_per_row = 2 * (4 * d_in + store_bytes * slab_width)  # dbl-buffered
    cap = act_budget // max(bytes_per_row, 1)
    cap = max(row_align, min(int(cap), max_rows))
    cap = (cap // row_align) * row_align
    b_rows = _round_up(max(B, 1), row_align)
    tb = min(b_rows, cap)
    if b_rows >= 2 * row_align:
        half = _round_up(-(-b_rows // 2), row_align)
        tb = min(tb, half)   # guarantees >=2 grid blocks -> both TCs on v7x
    return max(row_align, tb)


@functools.partial(jax.jit, static_argnames=("batch_tile", "store_dtype"))
def deep_occ_forward(x, weights, *, batch_tile=None, store_dtype=jnp.float32):
    """Forward pass of deepOccModule.

    Returns (output, intermediate_outputs); intermediate_outputs is keyed by
    the sequential module index as a string ("0", "1", ...), exactly like
    IntermediateSequential.
    """
    weights = tuple(weights)
    num_layers = len(weights)
    B, d_in = x.shape
    assert weights[0].shape[1] == d_in

    # Linear output widths and their column offsets inside the packed slab.
    lin_dims = tuple(int(w.shape[0]) for w in weights)
    col_offsets = []
    c = 0
    for d in lin_dims:
        col_offsets.append(c)
        c += d
    col_offsets = tuple(col_offsets)
    slab_width = _round_up(c, 128)              # lane-dense output slab
    store_bytes = int(jnp.dtype(store_dtype).itemsize)

    # --- generation-aware VMEM + batch tiling ---
    vmem_limit, act_budget = _vmem_budget()
    row_align = 8 if store_bytes == 4 else 16   # bf16 packs 2 rows/sublane
    tb = batch_tile if batch_tile is not None else _choose_batch_tile(
        B, d_in, slab_width, store_bytes, act_budget, row_align=row_align)
    tb = max(row_align, (tb // row_align) * row_align)
    n_blocks = -(-B // tb)
    B_pad = n_blocks * tb
    if B_pad != B:
        x = jnp.pad(x, ((0, B_pad - B), (0, 0)))   # safe: bias-free, ReLU(0)=0

    # Pre-transpose weights ONCE in the wrapper (outside the grid loop).
    weights_t = tuple(jnp.transpose(w) for w in weights)   # [in, out]

    out_shape = jax.ShapeDtypeStruct((B_pad, slab_width), store_dtype)
    x_spec = pl.BlockSpec((tb, d_in), lambda i: (i, 0))
    w_specs = [pl.BlockSpec(wt.shape, lambda i: (0, 0)) for wt in weights_t]
    out_spec = pl.BlockSpec((tb, slab_width), lambda i: (i, 0))

    kernel = _make_mlp_kernel(num_layers, lin_dims, col_offsets,
                              slab_width, store_dtype)

    flops = 2 * B_pad * sum(int(w.shape[0]) * int(w.shape[1]) for w in weights)
    bytes_accessed = (4 * B_pad * d_in
                      + store_bytes * B_pad * slab_width
                      + 4 * sum(int(w.size) for w in weights))
    cost = pl.CostEstimate(flops=flops, transcendentals=0,
                           bytes_accessed=bytes_accessed)

    slab = pl.pallas_call(
        kernel,
        out_shape=out_shape,
        grid=(n_blocks,),
        in_specs=[x_spec] + w_specs,
        out_specs=out_spec,
        compiler_params=pltpu.CompilerParams(
            dimension_semantics=("parallel",),
            vmem_limit_bytes=vmem_limit),
        cost_estimate=cost,
    )(x, *weights_t)

    # Slice per-Linear outputs back out of the lane-dense slab; reconstruct
    # the ReLU intermediates in the wrapper (XLA fuses the maximum).
    lin_outs = [slab[:B, off:off + d].astype(jnp.float32)
                for off, d in zip(col_offsets, lin_dims)]
    intermediate_outputs = {}
    idx = 0
    for l in range(num_layers):
        intermediate_outputs[str(idx)] = lin_outs[l]
        idx += 1
        if l < num_layers - 1:
            intermediate_outputs[str(idx)] = jnp.maximum(lin_outs[l], 0.0)
            idx += 1
    output = lin_outs[-1]
    return output, intermediate_outputs


def _reference_forward(x, weights):
    """Pure-JAX reference mirroring the PyTorch module semantics."""
    act = x
    inter = {}
    idx = 0
    for l, w in enumerate(weights):
        act = act @ w.T
        inter[str(idx)] = act
        idx += 1
        if l < len(weights) - 1:
            act = jnp.maximum(act, 0.0)
            inter[str(idx)] = act
            idx += 1
    return act, inter


if __name__ == "__main__":
    # topology = [32, 64, 32, 16]
    #   -> Linear(32,64) ReLU Linear(64,32) ReLU Linear(32,16)
    # TODO(synk): nn.Dropout branch (dropout>0) not implemented; the default
    # dropout=0.0 module has no Dropout layers, matching this kernel.
    topology = [32, 64, 32, 16]
    batch = 8

    key = jax.random.PRNGKey(0)
    key, xkey = jax.random.split(key)
    x = jax.random.normal(xkey, (batch, topology[0]), jnp.float32)
    weights = init_deep_occ_params(topology, key)

    output, intermediates = deep_occ_forward(x, weights)
    output = jax.block_until_ready(output)

    # Correctness check against a plain-JAX reference.
    ref_out, ref_inter = _reference_forward(x, weights)
    assert jnp.allclose(output, ref_out, atol=1e-5, rtol=1e-5)
    for k in ref_inter:
        assert jnp.allclose(intermediates[k], ref_inter[k],
                            atol=1e-5, rtol=1e-5)

    print("KERNEL_OK")
</pallas_src>

<mosaic_0001>
module attributes {stable_mosaic.version = 11 : i64} {
  func.func @kernel(%arg0: i32, %arg1: memref<8x32xf32, #tpu.memory_space<vmem>>, %arg2: memref<32x64xf32, #tpu.memory_space<vmem>>, %arg3: memref<64x32xf32, #tpu.memory_space<vmem>>, %arg4: memref<32x16xf32, #tpu.memory_space<vmem>>, %arg5: memref<8x128xf32, #tpu.memory_space<vmem>>) attributes {dimension_semantics = [#tpu.dimension_semantics<parallel>], iteration_bounds = array<i64: 1>, scalar_prefetch = 0 : i64, scratch_operands = 0 : i64, tpu.core_type = #tpu.core_type<tc>, window_params = [{transform_indices = @transform_0, window_bounds = array<i64: 8, 32>}, {pipeline_mode = #tpu.pipeline_mode<synchronous>, transform_indices = @transform_1, window_bounds = array<i64: 32, 64>}, {pipeline_mode = #tpu.pipeline_mode<synchronous>, transform_indices = @transform_2, window_bounds = array<i64: 64, 32>}, {pipeline_mode = #tpu.pipeline_mode<synchronous>, transform_indices = @transform_3, window_bounds = array<i64: 32, 16>}, {transform_indices = @transform_4, window_bounds = array<i64: 8, 128>}]} {
    %c0 = arith.constant 0 : index
    %c0_0 = arith.constant 0 : index
    %0 = vector.load %arg1[%c0, %c0_0] : memref<8x32xf32, #tpu.memory_space<vmem>>, vector<8x32xf32>
    %c0_1 = arith.constant 0 : index
    %c0_2 = arith.constant 0 : index
    %1 = vector.load %arg2[%c0_1, %c0_2] : memref<32x64xf32, #tpu.memory_space<vmem>>, vector<32x64xf32>
    %cst = arith.constant dense<0.000000e+00> : vector<8x64xf32>
    %2 = tpu.matmul %0, %1, %cst {dimension_numbers = #tpu.dot_dimension_numbers<[1], [0], [0], [1], [0, 0, 1, 1], [], []>} : vector<8x32xf32>, vector<32x64xf32>, vector<8x64xf32> -> vector<8x64xf32>
    %c0_3 = arith.constant 0 : index
    %c0_4 = arith.constant 0 : index
    %3 = vector.load %arg5[%c0_3, %c0_4] : memref<8x128xf32, #tpu.memory_space<vmem>>, vector<8x64xf32>
    tpu.vector_store %arg5[%c0_3, %c0_4], %2 {strides = array<i32>} : memref<8x128xf32, #tpu.memory_space<vmem>>, vector<8x64xf32>,
    %cst_5 = arith.constant 0.000000e+00 : f32
    %4 = vector.broadcast %cst_5 : f32 to vector<8x64xf32>
    %5 = arith.maximumf %2, %4 : vector<8x64xf32>
    %c0_6 = arith.constant 0 : index
    %c0_7 = arith.constant 0 : index
    %6 = vector.load %arg3[%c0_6, %c0_7] : memref<64x32xf32, #tpu.memory_space<vmem>>, vector<64x32xf32>
    %cst_8 = arith.constant dense<0.000000e+00> : vector<8x32xf32>
    %7 = tpu.matmul %5, %6, %cst_8 {dimension_numbers = #tpu.dot_dimension_numbers<[1], [0], [0], [1], [0, 0, 1, 1], [], []>} : vector<8x64xf32>, vector<64x32xf32>, vector<8x32xf32> -> vector<8x32xf32>
    %c0_9 = arith.constant 0 : index
    %c64 = arith.constant 64 : index
    %8 = vector.load %arg5[%c0_9, %c64] : memref<8x128xf32, #tpu.memory_space<vmem>>, vector<8x32xf32>
    tpu.vector_store %arg5[%c0_9, %c64], %7 {strides = array<i32>} : memref<8x128xf32, #tpu.memory_space<vmem>>, vector<8x32xf32>,
    %cst_10 = arith.constant 0.000000e+00 : f32
    %9 = vector.broadcast %cst_10 : f32 to vector<8x32xf32>
    %10 = arith.maximumf %7, %9 : vector<8x32xf32>
    %c0_11 = arith.constant 0 : index
    %c0_12 = arith.constant 0 : index
    %11 = vector.load %arg4[%c0_11, %c0_12] : memref<32x16xf32, #tpu.memory_space<vmem>>, vector<32x16xf32>
    %cst_13 = arith.constant dense<0.000000e+00> : vector<8x16xf32>
    %12 = tpu.matmul %10, %11, %cst_13 {dimension_numbers = #tpu.dot_dimension_numbers<[1], [0], [0], [1], [0, 0, 1, 1], [], []>} : vector<8x32xf32>, vector<32x16xf32>, vector<8x16xf32> -> vector<8x16xf32>
    %c0_14 = arith.constant 0 : index
    %c96 = arith.constant 96 : index
    %13 = vector.load %arg5[%c0_14, %c96] : memref<8x128xf32, #tpu.memory_space<vmem>>, vector<8x16xf32>
    tpu.vector_store %arg5[%c0_14, %c96], %12 {strides = array<i32>} : memref<8x128xf32, #tpu.memory_space<vmem>>, vector<8x16xf32>,
    %cst_15 = arith.constant 0.000000e+00 : f32
    %14 = vector.broadcast %cst_15 : f32 to vector<8x16xf32>
    %c0_16 = arith.constant 0 : index
    %c112 = arith.constant 112 : index
    %15 = vector.load %arg5[%c0_16, %c112] : memref<8x128xf32, #tpu.memory_space<vmem>>, vector<8x16xf32>
    tpu.vector_store %arg5[%c0_16, %c112], %14 {strides = array<i32>} : memref<8x128xf32, #tpu.memory_space<vmem>>, vector<8x16xf32>,
    return
  }
  func.func @transform_0(%arg0: i32) -> (i32, i32) {
    %c0_i32 = arith.constant 0 : i32
    %c0_i32_0 = arith.constant 0 : i32
    return %arg0, %c0_i32 : i32, i32
  }
  func.func @transform_1(%arg0: i32) -> (i32, i32) {
    %c0_i32 = arith.constant 0 : i32
    %c0_i32_0 = arith.constant 0 : i32
    %c0_i32_1 = arith.constant 0 : i32
    return %c0_i32, %c0_i32_0 : i32, i32
  }
  func.func @transform_2(%arg0: i32) -> (i32, i32) {
    %c0_i32 = arith.constant 0 : i32
    %c0_i32_0 = arith.constant 0 : i32
    %c0_i32_1 = arith.constant 0 : i32
    return %c0_i32, %c0_i32_0 : i32, i32
  }
  func.func @transform_3(%arg0: i32) -> (i32, i32) {
    %c0_i32 = arith.constant 0 : i32
    %c0_i32_0 = arith.constant 0 : i32
    %c0_i32_1 = arith.constant 0 : i32
    return %c0_i32, %c0_i32_0 : i32, i32
  }
  func.func @transform_4(%arg0: i32) -> (i32, i32) {
    %c0_i32 = arith.constant 0 : i32
    %c0_i32_0 = arith.constant 0 : i32
    return %arg0, %c0_i32 : i32, i32
  }
}

</mosaic_0001>

<bundles_post_ra>
// kernel: deep_occ_forward.1
= control target key start
LH: loop header
LB: loop body
LE: loop exit
PB: predicated region body
PF: predicated region fallthrough
CT: control target
= control target key end

     0   :  { %vm22_vm0 = vcmask 261120   ;;  %vm46_vm1 = vcmask 523264   ;;  %s132_s22 = smov 64   ;;  %vm84_vm2 = vcmask 785920   ;;  %s133_s25 = smov 96   ;;  %vm118_vm3 = vcmask 917248   ;;  %s225_s1 = inlined_call_operand.vmem [shape: f32[32,64], index: 1, kind: input, shape index: {}]   ;;  %s226_s2 = inlined_call_operand.vmem [shape: f32[64,32], index: 2, kind: input, shape index: {}]   ;;  %s227_s0 = inlined_call_operand.vmem [shape: f32[8,32], index: 0, kind: input, shape index: {}]   ;;  %s228_s3 = inlined_call_operand.vmem [shape: f32[32,16], index: 3, kind: input, shape index: {}]   ;;  %s229_s4 = inlined_call_operand.vmem [shape: f32[8,128], index: 4, kind: output, shape index: {}]  }
   0x1   :  { %v21_v0 = vld [vmem:[%s225_s1 + $0x18] sm:$0xff]  ;;  %v20_v1 = vld [vmem:[%s225_s1 + $0x10] sm:$0xff]  ;;  %v19_v3 = vld [vmem:[%s225_s1 + $0x8] sm:$0xff]  ;;  %vm120_vm4 = vcmask 1048448   ;;  %v134_v24 = vmov 0.0  }
   0x2   :  { %38 = vmatpush.msra.mxu0 %v21_v0  ;;  %v56_v2 = vld [vmem:[%s226_s2 + $0x38] sm:$0xff]  ;;  %v55_v4 = vld [vmem:[%s226_s2 + $0x30] sm:$0xff]  ;;  %v54_v5 = vld [vmem:[%s226_s2 + $0x28] sm:$0xff] }
   0x3   :  { %68 = vmatpush.msra.mxu1 %v56_v2  ;;  %v18_v6 = vld [vmem:[%s225_s1] sm:$0xff]  ;;  %v52_v9 = vld [vmem:[%s226_s2 + $0x18] sm:$0xff]  ;;  %v51_v10 = vld [vmem:[%s226_s2 + $0x10] sm:$0xff] }
   0x4   :  { %39 = vmatpush.msra.mxu0 %v20_v1  ;;  %v17_v7 = vld [vmem:[%s227_s0] sm:$0xff]  ;;  %v50_v11 = vld [vmem:[%s226_s2 + $0x8] sm:$0xff]  ;;  %v90_v13 = vld [vmem:[%s228_s3 + $0x18] sm:$0xff] }
   0x5   :  { %69 = vmatpush.msra.mxu1 %v55_v4  ;;  %v53_v8 = vld [vmem:[%s226_s2 + $0x20] sm:$0xff]  ;;  %v89_v14 = vld [vmem:[%s228_s3 + $0x10] sm:$0xff]  ;;  %106 = vmatpush.msra.mxu2 %v90_v13  ;;  %v88_v17 = vld [vmem:[%s228_s3 + $0x8] sm:$0xff] }
   0x6   :  { %40 = vmatpush.msra.mxu0 %v19_v3  ;;  %v49_v12 = vld [vmem:[%s226_s2] sm:$0xff] }
   0x7   :  { %70 = vmatpush.msra.mxu1 %v54_v5  ;;  %107 = vmatpush.msra.mxu2 %v89_v14  ;;  %v87_v18 = vld [vmem:[%s228_s3] sm:$0xff] }
   0x8   :  { %41 = vmatpush.msra.mxu0 %v18_v6 }
   0x9   :  { %126 = vmatmul.msk.f32.vlgmr.msra.gmra.mxu0 %vm22_vm0, %v17_v7  ;;  %71 = vmatpush.msra.mxu1 %v53_v8 }
   0xa   :  { %108 = vmatpush.msra.mxu2 %v88_v17 }
   0xb   :  { %72 = vmatpush.msra.mxu1 %v52_v9 }
   0xc   :  { %109 = vmatpush.msra.mxu2 %v87_v18 }
   0xd   :  { %73 = vmatpush.msra.mxu1 %v51_v10 }
   0xf   :  { %74 = vmatpush.msra.mxu1 %v50_v11 }
  0x11   :  { %75 = vmatpush.msra.mxu1 %v49_v12 }
  0x86   :  { %v43_v15 = vpop.f32.mrf.mxu0 }
  0x87   :  { %47 = vst.msk [vmem:[%s229_s4] sm:$0xff] %vm46_vm1, %v43_v15  ;;  %v48_v16 = vmax.f32 %v43_v15, 0.0 }
  0x89   :  { %127 = vmatmul.msk.f32.vlgmr.msra.gmra.mxu1 %vm46_vm1, %v48_v16 }
 0x106   :  { %v77_v19 = vpop.f32.mrf.mxu1 }
 0x107   :  { %v86_v20 = vmax.f32 %v77_v19, 0.0  ;;  %81 = vrot.lane.b32.xlu0 %v77_v19, %s132_s22 }
 0x109   :  { %128 = vmatmul.msk.f32.vlgmr.msra.gmra.mxu2 %vm22_vm0, %v86_v20 }
 0x179   :  { %v82_v21 = vpop.permute.xlu0 %81 }
 0x17a   :  { %85 = vst.msk [vmem:[%s229_s4] sm:$0xff] %vm84_vm2, %v82_v21 }
 0x18c   :  { %v111_v22 = vpop.f32.mrf.mxu2 }
 0x18d   :  { %115 = vrot.lane.b32.xlu0 %v111_v22, %s133_s25 }
 0x1ff   :  { %v116_v23 = vpop.permute.xlu0 %115 }
 0x200   :  { %119 = vst.msk [vmem:[%s229_s4] sm:$0xff] %vm118_vm3, %v116_v23 }
 0x201   :  { %121 = vst.msk [vmem:[%s229_s4] sm:$0xff] %vm120_vm4, %v134_v24 }

</bundles_post_ra>
